<compile_context>
chip_gen: v5e
topology: v5e:2x2
jax: 0.10.0
libtpu: 0.0.40
codegen_flags: <defaults>
</compile_context>

<pallas_src>
import functools

import jax
import jax.numpy as jnp
from jax.experimental import pallas as pl
from jax.experimental.pallas import tpu as pltpu

LANES = 128
BLOCK_ROWS = 8192                       # 8192 x 128 f32 = 4 MiB per block
TILED_VMEM_LIMIT = 32 * 1024 * 1024     # covers 2x in + 2x out 4 MiB buffers
NUM_CORE_SPLITS = 2                     # split pass-1 across (up to) 2 TensorCores


@functools.lru_cache(maxsize=None)
def _fused_config():
    """Generation-aware fused-path threshold (f32-copy bytes) and VMEM limit."""
    try:
        vmem = int(pltpu.get_tpu_info().vmem_capacity_bytes)
    except Exception:
        vmem = 64 * 1024 * 1024         # conservative (v7x-sized) fallback
    # Fused kernel holds roughly 3x the f32 copy (input + output + x*x temp).
    threshold = int(min(vmem // 10, 12 * 1024 * 1024))
    vmem_limit = int(min(vmem // 2, 64 * 1024 * 1024))
    return threshold, vmem_limit


def _fused_kernel(x_ref, y_ref, norm_ref):
    """Whole tensor resident in VMEM: one HBM read of x, one HBM write of y."""
    x = x_ref[...].astype(jnp.float32)
    ssq = jnp.sum(x * x, keepdims=True)             # (1, 1)
    norm = jnp.sqrt(ssq)
    norm_ref[...] = norm
    # NOTE: norm == 0 gives Inf/NaN, matching a naive x / ||x|| (no epsilon).
    y_ref[...] = (x * (1.0 / norm)).astype(y_ref.dtype)


def _make_sumsq_kernel(m_rows, block_rows, nbc, need_mask):
    """Pass 1 (tiled): per-lane streaming sum-of-squares with a (1,128) accumulator.

    Grid is (splits, blocks_per_split); axis 0 is 'parallel' (one split per
    TensorCore on v7x), axis 1 is 'arbitrary'. Each split writes its per-lane
    partial into its own (1,128) slice of the output.
    """

    def kernel(x_ref, part_ref, acc_ref):
        c = pl.program_id(0)
        i = pl.program_id(1)

        @pl.when(i == 0)
        def _():
            acc_ref[...] = jnp.zeros_like(acc_ref)

        x = x_ref[...].astype(jnp.float32)

        if need_mask:
            row0 = (c * nbc + i) * block_rows
            is_tail = row0 + block_rows > m_rows     # ragged or fully-OOB block

            @pl.when(jnp.logical_not(is_tail))
            def _():
                # Hot path: pure VALU reduce into the tiny per-lane accumulator.
                acc_ref[...] += jnp.sum(x * x, axis=0, keepdims=True)

            @pl.when(is_tail)
            def _():
                row = jax.lax.broadcasted_iota(jnp.int32, x.shape, 0) + row0
                xm = jnp.where(row < m_rows, x, 0.0)
                acc_ref[...] += jnp.sum(xm * xm, axis=0, keepdims=True)
        else:
            acc_ref[...] += jnp.sum(x * x, axis=0, keepdims=True)

        @pl.when(i == pl.num_programs(1) - 1)
        def _():
            part_ref[...] = acc_ref[...]

    return kernel


def _div_kernel(inv_ref, x_ref, o_ref):
    """Pass 2 (tiled): broadcast-multiply each block by 1/norm (scalar in SMEM)."""
    inv = inv_ref[0, 0]
    o_ref[...] = (x_ref[...].astype(jnp.float32) * inv).astype(o_ref.dtype)


def layer_div(x, *, force_tiled=False, block_rows=None):
    """Pallas implementation of LayerDiv.forward: returns (x / ||x||_F, ||x||_F)."""
    orig_shape = x.shape
    orig_dtype = x.dtype
    flat = x.reshape(-1)
    n = flat.shape[0]

    padded = (n % LANES) != 0
    if padded:
        # TODO(synk): zero-copy ragged-lane handling (1-D blocks + lane mask)
        # would avoid this extra pad/slice HBM traffic; zeros are neutral for
        # the sum-of-squares norm so correctness is unaffected.
        pad_to = pl.cdiv(n, LANES) * LANES
        flat = jnp.pad(flat, (0, pad_to - n))
    x2d = flat.reshape(-1, LANES)
    M = x2d.shape[0]

    fused_threshold, fused_vmem_limit = _fused_config()
    f32_copy_bytes = M * LANES * 4

    if (f32_copy_bytes <= fused_threshold) and not force_tiled:
        # --- Fused single-pass path (small / mid tensors) ------------------------
        y2d, norm2d = pl.pallas_call(
            _fused_kernel,
            out_shape=(jax.ShapeDtypeStruct(x2d.shape, orig_dtype),
                       jax.ShapeDtypeStruct((1, 1), jnp.float32)),
            compiler_params=pltpu.CompilerParams(
                vmem_limit_bytes=fused_vmem_limit),
        )(x2d)
        norm = norm2d[0, 0]
    else:
        # --- Tiled two-pass path (large tensors) ---------------------------------
        br = BLOCK_ROWS if block_rows is None else int(block_rows)
        br = min(br, M)
        nb = pl.cdiv(M, br)                     # total blocks
        splits = NUM_CORE_SPLITS if nb >= NUM_CORE_SPLITS else 1
        nbc = pl.cdiv(nb, splits)               # blocks per split
        exact = (splits * nbc == nb)
        need_mask = (M % br != 0) or (not exact)

        if exact:
            x_map = lambda c, i: (c * nbc + i, 0)
        else:
            # Clamp so duplicated trailing steps never DMA out of bounds; the
            # in-kernel row mask zeroes their contribution.
            x_map = lambda c, i: (jnp.minimum(c * nbc + i, nb - 1), 0)

        # Pass 1: per-split per-lane partial sums of squares.
        partials = pl.pallas_call(
            _make_sumsq_kernel(M, br, nbc, need_mask),
            out_shape=jax.ShapeDtypeStruct((1, splits * LANES), jnp.float32),
            grid=(splits, nbc),
            in_specs=[pl.BlockSpec((br, LANES), x_map)],
            out_specs=pl.BlockSpec((1, LANES), lambda c, i: (0, c)),
            scratch_shapes=[pltpu.VMEM((1, LANES), jnp.float32)],
            compiler_params=pltpu.CompilerParams(
                dimension_semantics=("parallel", "arbitrary"),
                vmem_limit_bytes=TILED_VMEM_LIMIT),
        )(x2d)

        # Tiny scalar epilogue in plain JAX (exact sqrt / divide, per review).
        ssq = jnp.sum(partials)
        norm = jnp.sqrt(ssq)
        inv2d = (1.0 / norm).reshape(1, 1).astype(jnp.float32)

        # Pass 2: elementwise multiply by 1/norm (scalar delivered via SMEM).
        y2d = pl.pallas_call(
            _div_kernel,
            out_shape=jax.ShapeDtypeStruct(x2d.shape, orig_dtype),
            grid=(nb,),
            in_specs=[pl.BlockSpec(memory_space=pltpu.MemorySpace.SMEM),
                      pl.BlockSpec((br, LANES), lambda i: (i, 0))],
            out_specs=pl.BlockSpec((br, LANES), lambda i: (i, 0)),
            compiler_params=pltpu.CompilerParams(
                dimension_semantics=("parallel",),
                vmem_limit_bytes=TILED_VMEM_LIMIT),
        )(inv2d, x2d)

    if padded:
        y = y2d.reshape(-1)[:n].reshape(orig_shape)
    else:
        y = y2d.reshape(orig_shape)
    return y, norm


class LayerDiv:
    """Mirror of the PyTorch module: no parameters; stores the norm on self."""

    def __init__(self):
        self.norm = None
        self._fn = jax.jit(layer_div)

    def __call__(self, x):
        y, norm = self._fn(x)
        self.norm = norm
        return y


if __name__ == "__main__":
    key = jax.random.PRNGKey(0)

    # 1) Small NCHW tensor (fused single-pass path).
    x = jax.random.normal(key, (2, 4, 16, 16), dtype=jnp.float32)
    layer = LayerDiv()
    y = jax.block_until_ready(layer(x))
    norm = jax.block_until_ready(layer.norm)

    ref_norm = jnp.sqrt(jnp.sum(x.astype(jnp.float32) ** 2))
    ref_y = x / ref_norm
    assert jnp.allclose(norm, ref_norm, rtol=1e-5, atol=1e-6), (norm, ref_norm)
    assert jnp.allclose(y, ref_y, rtol=1e-5, atol=1e-6)
    assert y.shape == x.shape and y.dtype == x.dtype

    # 2) Tiled two-pass path with small blocks to exercise: multi-block grid,
    #    two-way core split with an uneven (clamped) split, ragged-tail mask,
    #    and the SMEM scalar in pass 2. (M=3072 rows, br=1024 -> nb=3.)
    x2 = jax.random.normal(jax.random.PRNGKey(1), (3, 1024, 128), dtype=jnp.float32)
    y2, n2 = layer_div(x2, force_tiled=True, block_rows=1024)
    y2 = jax.block_until_ready(y2)
    ref_n2 = jnp.sqrt(jnp.sum(x2.astype(jnp.float32) ** 2))
    assert jnp.allclose(n2, ref_n2, rtol=1e-4, atol=1e-6), (n2, ref_n2)
    assert jnp.allclose(y2, x2 / ref_n2, rtol=1e-4, atol=1e-6)
    assert y2.shape == x2.shape and y2.dtype == x2.dtype

    # 3) Tiled path, even exact split (no mask branch compiled). nb=2, splits=2.
    x3 = jax.random.normal(jax.random.PRNGKey(2), (2, 1024, 128), dtype=jnp.float32)
    y3, n3 = layer_div(x3, force_tiled=True, block_rows=1024)
    y3 = jax.block_until_ready(y3)
    ref_n3 = jnp.sqrt(jnp.sum(x3.astype(jnp.float32) ** 2))
    assert jnp.allclose(n3, ref_n3, rtol=1e-4, atol=1e-6), (n3, ref_n3)
    assert jnp.allclose(y3, x3 / ref_n3, rtol=1e-4, atol=1e-6)

    print("KERNEL_OK")
</pallas_src>

<mosaic_0001>
module attributes {stable_mosaic.version = 11 : i64} {
  func.func @_fused_kernel(%arg0: memref<16x128xf32, #tpu.memory_space<vmem>>, %arg1: memref<16x128xf32, #tpu.memory_space<vmem>>, %arg2: memref<1x1xf32, #tpu.memory_space<vmem>>) attributes {dimension_semantics = [], scalar_prefetch = 0 : i64, scratch_operands = 0 : i64, tpu.core_type = #tpu.core_type<tc>} {
    %c0 = arith.constant 0 : index
    %c0_0 = arith.constant 0 : index
    %0 = vector.load %arg0[%c0, %c0_0] : memref<16x128xf32, #tpu.memory_space<vmem>>, vector<16x128xf32>
    %1 = arith.mulf %0, %0 : vector<16x128xf32>
    %2 = vector.shape_cast %1 : vector<16x128xf32> to vector<1x16x128xf32>
    %cst = arith.constant dense<0.000000e+00> : vector<1xf32>
    %3 = vector.multi_reduction <add>, %2, %cst [1, 2] : vector<1x16x128xf32> to vector<1xf32>
    %4 = vector.shape_cast %3 : vector<1xf32> to vector<1x1x1xf32>
    %5 = vector.extract %4[0, 0, 0] : f32 from vector<1x1x1xf32>
    %6 = vector.broadcast %5 : f32 to vector<1x1xf32>
    %7 = math.sqrt %6 : vector<1x1xf32>
    %c0_1 = arith.constant 0 : index
    %c0_2 = arith.constant 0 : index
    %8 = vector.load %arg2[%c0_1, %c0_2] : memref<1x1xf32, #tpu.memory_space<vmem>>, vector<1x1xf32>
    tpu.vector_store %arg2[%c0_1, %c0_2], %7 {strides = array<i32>} : memref<1x1xf32, #tpu.memory_space<vmem>>, vector<1x1xf32>,
    %cst_3 = arith.constant 1.000000e+00 : f32
    %9 = vector.broadcast %cst_3 : f32 to vector<1x1xf32>
    %10 = arith.divf %9, %7 : vector<1x1xf32>
    %11 = vector.broadcast %10 : vector<1x1xf32> to vector<16x128xf32>
    %12 = arith.mulf %0, %11 : vector<16x128xf32>
    %c0_4 = arith.constant 0 : index
    %c0_5 = arith.constant 0 : index
    %13 = vector.load %arg1[%c0_4, %c0_5] : memref<16x128xf32, #tpu.memory_space<vmem>>, vector<16x128xf32>
    tpu.vector_store %arg1[%c0_4, %c0_5], %12 {strides = array<i32>} : memref<16x128xf32, #tpu.memory_space<vmem>>, vector<16x128xf32>,
    return
  }
}

</mosaic_0001>

<bundles_post_ra>
// kernel: layer_div.1
= control target key start
LH: loop header
LB: loop body
LE: loop exit
PB: predicated region body
PF: predicated region fallthrough
CT: control target
= control target key end

     0   :  { %s143_s0 = inlined_call_operand.vmem [shape: f32[16,128], index: 0, kind: input, shape index: {}]   ;;  %s144_s1 = inlined_call_operand.vmem [shape: f32[16,128], index: 1, kind: output, shape index: {0}]   ;;  %s145_s2 = inlined_call_operand.hbm [shape: f32[1,1], index: 2, kind: output, shape index: {1}]  }
   0x1   :  { %v11_v0 = vld [vmem:[%s143_s0] sm:$0xff]  ;;  %v12_v1 = vld [vmem:[%s143_s0 + $0x8] sm:$0xff] }
   0x2   :  { %8 = vsyncpa [#allocation3], 0  ;;  %v13_v2 = vmul.f32 %v11_v0, %v11_v0  ;;  %v14_v3 = vmul.f32 %v12_v1, %v12_v1  ;;  %s112_s0 = smov [#allocation2]   ;;  %s68_s17 = sshll.u32 %s145_s2, 4  ;;  %vm38_vm1 = vcmask 0   ;;  %s69_s17 = int_to_ptr.hbm [resolvable:$true] %s68_s17 }
   0x3   :  { %s66_s14 = sshll.u32 %s112_s0, 4  ;;  %s67_s14 = int_to_ptr.vmem [resolvable:$true] %s66_s14 }
   0x4   :  { %v15_v4 = vadd.f32 %v14_v3, %v13_v2 }
   0x6   :  { %16 = vadd.xlane.f32.xlu0 %v15_v4 }
  0x79   :  { %v17_v5 = vpop.xlane.xlu0 %16 }
  0x7a   :  { %v18_v6 = vrot.slane %v17_v5, 4 }
  0x7c   :  { %v19_v7 = vadd.f32 %v18_v6, %v17_v5 }
  0x7e   :  { %v20_v8 = vrot.slane %v19_v7, 2 }
  0x80   :  { %v21_v9 = vadd.f32 %v20_v8, %v19_v7 }
  0x82   :  { %v22_v10 = vrot.slane %v21_v9, 1 }
  0x84   :  { %v23_v11 = vadd.f32 %v22_v10, %v21_v9 }
  0x86   :  { %79 = vpush %v23_v11 }
  0xb7   :  { %s80_s13 = spop %79 }
  0xb8   :  { %v25_v12 = vstv %s80_s13 }
  0xb9   :  { %82 = vrsqrt.f32 %v25_v12  ;;  %vm33_vm0 = vcmp.eq.f32.partialorder %v25_v12, inf  ;;  %v36_v20 = vand.u32 2147483648, %v25_v12  ;;  %vm35_vm2 = vcmp.eq.f32.partialorder %v25_v12, 0.0 }
  0xbf   :  { %v83_v13 = vpop.eup %82 }
  0xc0   :  { %v27_v14 = vmul.f32 %v83_v13, %v25_v12 }
  0xc2   :  { %v28_v15 = vmul.f32 %v83_v13, %v27_v14 }
  0xc4   :  { %v29_v16 = vmul.f32 0.5, %v28_v15 }
  0xc6   :  { %v30_v17 = vsub.f32 1.5, %v29_v16 }
  0xc8   :  { %v31_v18 = vmul.f32 %v83_v13, %v30_v17 }
  0xca   :  { %v32_v19 = vmul.f32 %v31_v18, %v25_v12 }
  0xcc   :  { %v34_v21 = vsel %vm33_vm0, %v25_v12, %v32_v19 }
  0xcd   :  { %v37_v22 = vsel %vm35_vm2, %v36_v20, %v34_v21 }
  0xce   :  { %39 = vst.msk [vmem:[#allocation2] sm:$0x1] %vm38_vm1, %v37_v22  ;;  %84 = vrcp.f32 %v37_v22  ;;  %v51_v26 = vand.u32 2147483648, %v37_v22  ;;  %v49_v28 = vand.u32 2147483647, %v37_v22  ;;  %vm45_vm4 = vweird.f32 %v37_v22 }
  0xcf   :  { %71 = dma.vmem_to_hbm [thread:$0]  %s67_s14, 16, %s69_s17, [#allocation3]  }
  0xd0   :  { %v52_v30 = vor.u32 1.1754944e-38, %v51_v26  ;;  %vm50_vm6 = vcmp.eq.f32.partialorder %v49_v28, 8.507059e+37 }
  0xd4   :  { %v85_v23 = vpop.eup %84 }
  0xd5   :  { %v41_v24 = vmul.f32 %v85_v23, %v37_v22  ;;  %vm46_vm3 = vweird.f32 %v85_v23 }
  0xd6   :  { %vm47_vm5 = vmor %vm45_vm4, %vm46_vm3 }
  0xd7   :  { %v42_v25 = vsub.f32 1.0, %v41_v24 }
  0xd9   :  { %v43_v27 = vmul.f32 %v85_v23, %v42_v25 }
  0xdb   :  { %v44_v29 = vadd.f32 %v85_v23, %v43_v27 }
  0xdd   :  { %v48_v31 = vsel %vm47_vm5, %v85_v23, %v44_v29 }
  0xde   :  { %v53_v32 = vsel %vm50_vm6, %v52_v30, %v48_v31 }
  0xdf   :  { %v55_v33 = vmul.f32 %v53_v32, %v11_v0  ;;  %v56_v34 = vmul.f32 %v53_v32, %v12_v1 }
  0xe1   :  { %57 = vst [vmem:[%s144_s1] sm:$0xff] %v55_v33 }
  0xe2   :  { %58 = vst [vmem:[%s144_s1 + $0x8] sm:$0xff] %v56_v34 }
  0xe3   :  { %110 = dma.done.wait [#allocation3], 16  }
  0xe4   :  { %111 = vsyncadd [#allocation3], 4294967280 }
  0xe5   :  { %78 = vsyncpa [#allocation3], 1 }

</bundles_post_ra>
